<compile_context>
chip_gen: v7x
topology: tpu7x:2x2x1
jax: 0.10.0
libtpu: 0.0.40
codegen_flags: <defaults>
</compile_context>

<pallas_src>
import jax
import jax.numpy as jnp
from jax.experimental import pallas as pl
from jax.experimental.pallas import tpu as pltpu


def _attention_kernel(h_ref, mask_ref, w_ref, b_ref, out_ref):
    """One batch tile of the attention forward.

    h_ref:    (tB, S, H)  hidden states (float32 or bfloat16), VMEM
    mask_ref: (tB, S)     int32, nonzero => position is masked (-inf score)
    w_ref:    (1, H)      float32 weight of nn.Linear(H, 1), VMEM (resident)
    b_ref:    (1,)        float32 bias of nn.Linear(H, 1), SMEM scalar
    out_ref:  (tB, 1, H)  float32 pooled output (squeezed outside the kernel)
    """
    h = h_ref[...]                                    # (tB, S, H)
    w = w_ref[...]                                    # (1, H) f32
    b = b_ref[0]                                      # f32 scalar

    # scores = Linear(hidden_states).squeeze(-1) -> (tB, S).
    # VPU multiply + lane reduce over H; bf16*f32 promotes to f32 so the
    # accumulation is always float32.
    # TODO(synk): an MXU form of this projection produces a (tB*S, 1) column
    # whose relayout to (tB, S) is a lane-changing reshape that is fragile for
    # small/unaligned S, so the VPU reduce is kept for robustness.
    scores = jnp.sum(h * w[None, :, :], axis=-1) + b  # (tB, S) f32

    # masked_fill(mask, -inf). (All-masked rows give NaN, matching PyTorch.)
    masked = jnp.where(mask_ref[...] != 0, -jnp.inf, scores)

    # Numerically stable softmax over the sequence axis, in float32.
    mx = jnp.max(masked, axis=-1, keepdims=True)
    e = jnp.exp(masked - mx)
    denom = jnp.sum(e, axis=-1, keepdims=True)
    attn = e * pl.reciprocal(denom, approx=True)      # EUP slot, ~free

    # bmm(attn.unsqueeze(1), hidden_states) as a batched MXU matmul
    # (batch=tB, M=1, K=S, N=H) with float32 accumulation. attn is fed to the
    # MXU in the hidden-states dtype (bf16 path keeps f32 accumulation).
    ctx = jnp.einsum(
        "bqs,bsh->bqh",
        attn[:, None, :].astype(h.dtype),
        h,
        preferred_element_type=jnp.float32,
    )                                                 # (tB, 1, H)
    out_ref[...] = ctx.astype(out_ref.dtype)


def _pick_batch_tile(batch, seq, hidden, in_itemsize, tile_budget_bytes):
    """Largest batch tile whose pipelined working set stays within budget."""
    # Double-buffered input tile + in-kernel f32 temporaries + mask + output.
    per_row = (seq * hidden * (2 * in_itemsize + 8)
               + 2 * seq * 4 + 2 * hidden * 4)
    tile = max(1, tile_budget_bytes // per_row)
    if tile >= batch:
        return batch
    # Partial-batch tiles put `tile` on a sublane axis of the (tile, S) mask
    # block, so it must be a multiple of 8.
    return min(batch, max(8, (tile // 8) * 8))
    # TODO(synk): for very long sequences also tile S with an online-softmax
    # accumulator so the per-step tile is bounded independently of S.


def attention_forward(hidden_states, mask, weight, bias, *,
                      input_dtype=jnp.float32,
                      block_b=None,
                      tile_budget_bytes=12 * 1024 * 1024,
                      vmem_limit_bytes=48 * 1024 * 1024):
    """Pallas TPU forward of the PyTorch `Attention` module.

    hidden_states: (B, S, H) float array
    mask:          (B, S) bool/int, True/nonzero => ignored position
    weight:        (1, H) = nn.Linear(H, 1).weight
    bias:          (1,)   = nn.Linear(H, 1).bias
    Returns (B, H) float32.
    """
    B, S, H = hidden_states.shape
    h = hidden_states.astype(input_dtype)
    mask_i32 = mask.astype(jnp.int32)
    w = jnp.asarray(weight, jnp.float32).reshape(1, H)
    b1d = jnp.asarray(bias, jnp.float32).reshape(1)

    if block_b is None:
        tb = _pick_batch_tile(B, S, H, jnp.dtype(input_dtype).itemsize,
                              tile_budget_bytes)
    else:
        tb = min(block_b, B)

    grid = (pl.cdiv(B, tb),)

    out3 = pl.pallas_call(
        _attention_kernel,
        out_shape=jax.ShapeDtypeStruct((B, 1, H), jnp.float32),
        grid=grid,
        in_specs=[
            pl.BlockSpec((tb, S, H), lambda i: (i, 0, 0)),       # hidden tile
            pl.BlockSpec((tb, S), lambda i: (i, 0)),             # mask tile
            pl.BlockSpec((1, H), lambda i: (0, 0)),              # weight
            pl.BlockSpec(memory_space=pltpu.MemorySpace.SMEM),   # bias scalar
        ],
        out_specs=pl.BlockSpec((tb, 1, H), lambda i: (i, 0, 0)),
        compiler_params=pltpu.CompilerParams(
            # Batch tiles are independent -> shard across TensorCores on v7x;
            # harmless on single-TC v5e/v6e.
            dimension_semantics=("parallel",),
            # Raise the scoped-VMEM limit above the 16/32 MiB defaults so the
            # double-buffered tiles fit (below v7x's 64 MiB physical VMEM).
            vmem_limit_bytes=vmem_limit_bytes,
        ),
    )(h, mask_i32, w, b1d)

    # (B, 1, H) -> (B, H): free reshape outside the kernel (keeps the kernel's
    # output block lane-dense and avoids an in-kernel squeeze relayout).
    return out3.reshape(B, H)


def attention_reference(hidden_states, mask, weight, bias):
    """Pure-JAX reference mirroring the PyTorch forward."""
    x = jnp.einsum("bsh,oh->bso", hidden_states, weight)[..., 0] + bias[0]
    x = jnp.where(mask, -jnp.inf, x)
    attn = jax.nn.softmax(x, axis=-1)[:, None, :]
    return jnp.einsum("bos,bsh->boh", attn, hidden_states)[:, 0, :]


if __name__ == "__main__":
    B, S, H = 2, 8, 32
    key = jax.random.PRNGKey(0)
    k_h, k_w, k_b = jax.random.split(key, 3)

    hidden_states = jax.random.normal(k_h, (B, S, H), dtype=jnp.float32)

    # mask: True where the position should be ignored; keep at least one valid
    # position per row so softmax is well defined (matches typical usage).
    lengths = jnp.array([5, 7], dtype=jnp.int32)
    mask = jnp.arange(S)[None, :] >= lengths[:, None]            # (B, S) bool

    # Deterministic nn.Linear(hidden_size, 1) parameters.
    weight = jax.random.normal(k_w, (1, H), dtype=jnp.float32) * 0.1
    bias = jax.random.normal(k_b, (1,), dtype=jnp.float32) * 0.1

    ref = attention_reference(hidden_states, mask, weight, bias)

    # Full-precision path (tolerance covers the EUP approximate reciprocal).
    out = jax.block_until_ready(
        attention_forward(hidden_states, mask, weight, bias))
    assert out.shape == (B, H)
    assert jnp.allclose(out, ref, atol=5e-3, rtol=5e-3), \
        "f32 kernel mismatch vs reference"

    # Reduced-precision path: bf16 hidden states into the MXU, f32 softmax/acc.
    out_bf16 = jax.block_until_ready(
        attention_forward(hidden_states, mask, weight, bias,
                          input_dtype=jnp.bfloat16))
    assert out_bf16.shape == (B, H)
    assert bool(jnp.all(jnp.isfinite(out_bf16)))
    assert jnp.allclose(out_bf16, ref, atol=5e-2, rtol=5e-2), \
        "bf16 kernel mismatch vs reference"

    print("KERNEL_OK")
</pallas_src>

<mosaic_0001>
module attributes {stable_mosaic.version = 11 : i64} {
  func.func @_attention_kernel(%arg0: i32, %arg1: memref<2x8x32xf32, #tpu.memory_space<vmem>>, %arg2: memref<2x8xi32, #tpu.memory_space<vmem>>, %arg3: memref<1x32xf32, #tpu.memory_space<vmem>>, %arg4: memref<1xf32, #tpu.memory_space<smem>>, %arg5: memref<2x1x32xf32, #tpu.memory_space<vmem>>) attributes {dimension_semantics = [#tpu.dimension_semantics<parallel>], iteration_bounds = array<i64: 1>, scalar_prefetch = 0 : i64, scratch_operands = 0 : i64, tpu.core_type = #tpu.core_type<tc>, window_params = [{transform_indices = @transform_0, window_bounds = array<i64: 2, 8, 32>}, {transform_indices = @transform_1, window_bounds = array<i64: 2, 8>}, {pipeline_mode = #tpu.pipeline_mode<synchronous>, transform_indices = @transform_2, window_bounds = array<i64: 1, 32>}, {transform_indices = @transform_3, window_bounds = array<i64: 1>}, {transform_indices = @transform_4, window_bounds = array<i64: 2, 1, 32>}]} {
    %c0 = arith.constant 0 : index
    %c0_0 = arith.constant 0 : index
    %c0_1 = arith.constant 0 : index
    %0 = vector.load %arg1[%c0, %c0_0, %c0_1] : memref<2x8x32xf32, #tpu.memory_space<vmem>>, vector<2x8x32xf32>
    %c0_2 = arith.constant 0 : index
    %c0_3 = arith.constant 0 : index
    %1 = vector.load %arg3[%c0_2, %c0_3] : memref<1x32xf32, #tpu.memory_space<vmem>>, vector<1x32xf32>
    %c0_4 = arith.constant 0 : index
    %2 = memref.load %arg4[%c0_4] : memref<1xf32, #tpu.memory_space<smem>>
    %3 = vector.shape_cast %1 : vector<1x32xf32> to vector<1x1x32xf32>
    %4 = vector.broadcast %3 : vector<1x1x32xf32> to vector<2x8x32xf32>
    %5 = arith.mulf %0, %4 : vector<2x8x32xf32>
    %cst = arith.constant dense<0.000000e+00> : vector<2x8xf32>
    %6 = vector.multi_reduction <add>, %5, %cst [2] : vector<2x8x32xf32> to vector<2x8xf32>
    %7 = vector.broadcast %2 : f32 to vector<2x8xf32>
    %8 = arith.addf %6, %7 : vector<2x8xf32>
    %c0_5 = arith.constant 0 : index
    %c0_6 = arith.constant 0 : index
    %9 = vector.load %arg2[%c0_5, %c0_6] : memref<2x8xi32, #tpu.memory_space<vmem>>, vector<2x8xi32>
    %c0_i32 = arith.constant 0 : i32
    %10 = vector.broadcast %c0_i32 : i32 to vector<2x8xi32>
    %11 = arith.cmpi ne, %9, %10 : vector<2x8xi32>
    %cst_7 = arith.constant 0xFF800000 : f32
    %12 = vector.broadcast %cst_7 : f32 to vector<2x8xf32>
    %13 = arith.select %11, %12, %8 : vector<2x8xi1>, vector<2x8xf32>
    %cst_8 = arith.constant dense<0xFF800000> : vector<2xf32>
    %14 = vector.multi_reduction <maximumf>, %13, %cst_8 [1] : vector<2x8xf32> to vector<2xf32>
    %15 = vector.shape_cast %14 : vector<2xf32> to vector<2x1xf32>
    %16 = vector.broadcast %15 : vector<2x1xf32> to vector<2x8xf32>
    %17 = arith.subf %13, %16 : vector<2x8xf32>
    %18 = math.exp %17 : vector<2x8xf32>
    %cst_9 = arith.constant dense<0.000000e+00> : vector<2xf32>
    %19 = vector.multi_reduction <add>, %18, %cst_9 [1] : vector<2x8xf32> to vector<2xf32>
    %20 = vector.shape_cast %19 : vector<2xf32> to vector<2x1xf32>
    %21 = tpu.reciprocal %20 {approx = true} : vector<2x1xf32> -> vector<2x1xf32>
    %22 = vector.broadcast %21 : vector<2x1xf32> to vector<2x8xf32>
    %23 = arith.mulf %18, %22 : vector<2x8xf32>
    %24 = vector.shape_cast %23 : vector<2x8xf32> to vector<2x1x8xf32>
    "tpu.trace_start"() <{level = 10 : i32, message = "bqs,bsh->bqh"}> : () -> ()
    %cst_10 = arith.constant dense<0.000000e+00> : vector<2x1x32xf32>
    %25 = tpu.matmul %24, %0, %cst_10 {dimension_numbers = #tpu.dot_dimension_numbers<[2], [1], [1], [2], [0, 0, 0, 1, 1, 2], [0], [0]>} : vector<2x1x8xf32>, vector<2x8x32xf32>, vector<2x1x32xf32> -> vector<2x1x32xf32>
    "tpu.trace_stop"() : () -> ()
    %c0_11 = arith.constant 0 : index
    %c0_12 = arith.constant 0 : index
    %c0_13 = arith.constant 0 : index
    %26 = vector.load %arg5[%c0_11, %c0_12, %c0_13] : memref<2x1x32xf32, #tpu.memory_space<vmem>>, vector<2x1x32xf32>
    tpu.vector_store %arg5[%c0_11, %c0_12, %c0_13], %25 {strides = array<i32>} : memref<2x1x32xf32, #tpu.memory_space<vmem>>, vector<2x1x32xf32>,
    return
  }
  func.func @transform_0(%arg0: i32) -> (i32, i32, i32) {
    %c0_i32 = arith.constant 0 : i32
    %c0_i32_0 = arith.constant 0 : i32
    %c0_i32_1 = arith.constant 0 : i32
    return %arg0, %c0_i32, %c0_i32_0 : i32, i32, i32
  }
  func.func @transform_1(%arg0: i32) -> (i32, i32) {
    %c0_i32 = arith.constant 0 : i32
    %c0_i32_0 = arith.constant 0 : i32
    return %arg0, %c0_i32 : i32, i32
  }
  func.func @transform_2(%arg0: i32) -> (i32, i32) {
    %c0_i32 = arith.constant 0 : i32
    %c0_i32_0 = arith.constant 0 : i32
    %c0_i32_1 = arith.constant 0 : i32
    return %c0_i32, %c0_i32_0 : i32, i32
  }
  func.func @transform_3(%arg0: i32) -> i32 {
    %c0_i32 = arith.constant 0 : i32
    %c0_i32_0 = arith.constant 0 : i32
    return %c0_i32 : i32
  }
  func.func @transform_4(%arg0: i32) -> (i32, i32, i32) {
    %c0_i32 = arith.constant 0 : i32
    %c0_i32_0 = arith.constant 0 : i32
    %c0_i32_1 = arith.constant 0 : i32
    return %arg0, %c0_i32, %c0_i32_0 : i32, i32, i32
  }
}

</mosaic_0001>

<bundles_post_ra>
// kernel: tpu_custom_call.1
= control target key start
LH: loop header
LB: loop body
LE: loop exit
PB: predicated region body
PF: predicated region fallthrough
CT: control target
= control target key end

     0   :  { %10 = vsyncpa [#allocation4], 0  ;;  %s418_s0 = inlined_call_operand.hbm [shape: f32[2,8,32], index: 0, kind: input, shape index: {}]   ;;  %s419_s1 = inlined_call_operand.vmem [shape: s32[2,8], index: 1, kind: input, shape index: {}]   ;;  %s420_s2 = inlined_call_operand.vmem [shape: f32[1,32], index: 2, kind: input, shape index: {}]   ;;  %s421_s3 = inlined_call_operand.<no memory space> [shape: f32[1], index: 3, kind: input, shape index: {}]   ;;  %s422_s4 = inlined_call_operand.hbm [shape: f32[2,1,32], index: 4, kind: output, shape index: {}]  }
   0x1   :  { %11 = vsyncpa [#allocation5], 0  ;;  %s351_s15 = smov [#allocation3]   ;;  %s303_s19 = scalar_lea.hbm %s418_s0, 256 }
   0x2   :  { %s17_s16 = sshll.u32 %s351_s15, 4  ;;  %p304_p0 = scmp.ne.s32.totalorder %s418_s0, %s303_s19  ;;  %s18_s16 = int_to_ptr.vmem [resolvable:$true] %s17_s16 }
   0x3   :  { %p307_p1 = scmp.lt.u32.totalorder %s303_s19, %s418_s0 }
   0x5   :  { %p309_p2 = pnand %p307_p1, %p304_p0 }
   0x7   :  { %312 = shalt.err (!%p309_p2)
}
   0x8   :  { %s313_s24 = scalar_lea.vmem %s18_s16, 256  ;;  %p318_p4 = scmp.lt.s32.totalorder %s18_s16, %s18_s16 }
   0x9   :  { %p314_p3 = scmp.ne.s32.totalorder %s18_s16, %s313_s24  ;;  %p319_p5 = scmp.lt.s32.totalorder %s313_s24, %s313_s24 }
   0xb   :  { %p320_p6 = por %p319_p5, %p318_p4 }
   0xd   :  { %p321_p7 = pnand %p320_p6, %p314_p3 }
   0xf   :  { %324 = shalt.err (!%p321_p7)
}
  0x10   :  { %s352_s25 = smov 128   ;;  %s353_s26 = smov 8  }
  0x11   :  { %23 = dma.hbm_to_vmem [thread:$0]  %s418_s0, 256, %s18_s16, [#allocation4], %s352_s25, %s352_s25, %s353_s26  }
  0x12   :  { %347 = dma.done.wait [#allocation4], 256  }
  0x13   :  { %348 = vsyncadd [#allocation4], 4294967040  ;;  %v33_v0 = vld [vmem:[#allocation3] sm:$0xff]  ;;  %vm45_vm0 = vcmask 261120   ;;  %v34_v2 = vld [vmem:[#allocation3 + $0x8] sm:$0xff]  ;;  %v59_v7 = vlaneseq  ;;  %v52_v10 = vstv %s421_s3  ;;  %vm69_vm1 = vcmask 1041409  }
  0x14   :  { %v273_v1 = vld [vmem:[%s420_s2] ss:$0 sm:$0xff]  ;;  %vm73_vm3 = vcmask 58368   ;;  %v354_v27 = vmov 0.0   ;;  %vm355_vm4 = vmmov 0   ;;  %vm108_vm5 = vcmask 64512  }
  0x15   :  { %v43_v3 = vmul.f32 %v273_v1, %v33_v0  ;;  %v44_v4 = vmul.f32 %v273_v1, %v34_v2  ;;  %v60_v8 = vand.u32 127, %v59_v7  ;;  %v62_v9 = vshrl.u32 %v59_v7, 7  ;;  %v55_v15 = vld [vmem:[%s419_s1] sm:$0x3]  ;;  %280 = vmatprep.subr.mxu0 %v354_v27  ;;  %282 = vmatprep.mubr.msk.f32.mxu0 %vm355_vm4, %v354_v27  ;;  %s357_s1 = smov [#allocation6]  }
  0x16   :  { %vm56_vm2 = vcmp.ne.s32.totalorder %v55_v15, 0  ;;  %281 = vmatpush3.msra.mxu0 %v33_v0  ;;  %285 = vmatprep.subr.mxu1 %v354_v27  ;;  %v356_v29 = vmov 1966171168   ;;  %s261_s3 = sshll.u32 %s357_s1, 4  ;;  %vm253_vm6 = vcmask 253952   ;;  %s262_s3 = int_to_ptr.vmem [resolvable:$true] %s261_s3 }
  0x17   :  { %v46_v5 = vsel %vm45_vm0, %v43_v3, 0.0  ;;  %v49_v6 = vsel %vm45_vm0, %v44_v4, 0.0  ;;  %v63_v12 = vsub.s32 %v60_v8, %v62_v9  ;;  %286 = vmatpush3.msra.mxu1 %v34_v2  ;;  %287 = vmatprep.mubr.msk.f32.mxu1 %vm355_vm4, %v354_v27  ;;  %v87_v30 = vunpack.c.l.s4 %v356_v29  ;;  %s325_s7 = scalar_lea.vmem %s262_s3, 32  ;;  %p330_p9 = scmp.lt.s32.totalorder %s262_s3, %s262_s3 }
  0x18   :  { %47 = vadd.xlane.f32.xlu0 %v46_v5  ;;  %p326_p8 = scmp.ne.s32.totalorder %s262_s3, %s325_s7  ;;  %p331_p10 = scmp.lt.s32.totalorder %s325_s7, %s325_s7 }
  0x19   :  { %v88_v31 = vunpack.c.0.s8 %v87_v30 }
  0x1a   :  { %p332_p11 = por %p331_p10, %p330_p9 }
  0x1b   :  { %v91_v32 = vsub.s32 %v88_v31, %v62_v9 }
  0x1c   :  { %50 = vadd.xlane.f32.xlu0 %v49_v6  ;;  %p333_p12 = pnand %p332_p11, %p326_p8 }
  0xa5   :  { %v48_v11 = vpop.xlane.xlu0 %47 }
  0xa6   :  { %v53_v13 = vadd.f32 %v52_v10, %v48_v11 }
  0xa8   :  { %v64_v17 = vrot.slane %v53_v13, %v63_v12 }
  0xa9   :  { %v51_v14 = vpop.xlane.xlu0 %50 }
  0xaa   :  { %v54_v16 = vadd.f32 %v52_v10, %v51_v14 }
  0xac   :  { %v68_v18 = vrot.slane %v54_v16, %v63_v12 }
  0xae   :  { %v70_v19 = vsel %vm69_vm1, %v68_v18, %v64_v17 }
  0xaf   :  { %v72_v20 = vsel %vm56_vm2, -inf, %v70_v19 }
  0xb0   :  { %v74_v21 = vsel %vm73_vm3, %v72_v20, -inf }
  0xb1   :  { %75 = vmax.xlane.f32.xlu1 %v74_v21 }
 0x13e   :  { %v76_v22 = vpop.xlane.xlu1 %75 }
 0x13f   :  { %v77_v23 = vsub.f32 %v72_v20, %v76_v22 }
 0x141   :  { %v78_v24 = vmul.f32 1.442695, %v77_v23 }
 0x143   :  { %299 = vpow2.f32 %v78_v24 }
 0x14d   :  { %v300_v25 = vpop.eup %299 }
 0x14e   :  { %v80_v26 = vsel %vm73_vm3, %v300_v25, 0.0 }
 0x14f   :  { %81 = vadd.xlane.f32.xlu1 %v80_v26 }
 0x1dc   :  { %v82_v28 = vpop.xlane.xlu1 %81 }
 0x1dd   :  { %301 = vrcp.f32 %v82_v28 }
 0x1e7   :  { %v302_v33 = vpop.eup %301 }
 0x1e8   :  { %v84_v34 = vmul.f32 %v302_v33, %v300_v25 }
 0x1ea   :  { %v92_v35 = vrot.slane %v84_v34, %v91_v32 }
 0x1ec   :  { %v100_v36 = vrot.slane %v92_v35, %v91_v32  ;;  %v93_v37 = vcombine.high %v92_v35, %v92_v35 }
 0x1ee   :  { %283 = vmatmul.mubr.msk.f32.vlgmr.msra.gmra.mrb[0].mxu0 %vm108_vm5, %v100_v36  ;;  %v107_v38 = vrot.slane %v93_v37, %v91_v32 }
 0x1f0   :  { %288 = vmatmul.mubr.msk.f32.vlgmr.msra.gmra.mrb[0].mxu1 %vm108_vm5, %v107_v38 }
 0x2c1   :  { %v177_v39 = vpop.f32.mrb[0].mxu0 }
 0x2c2   :  { %254 = vst.msk [vmem:[#allocation6] sm:$0x1] %vm253_vm6, %v177_v39  ;;  %v284_v40 = vpop.f32.mrb[1].mxu0 }
 0x2c3   :  { %v249_v41 = vpop.f32.mrb[0].mxu1 }
 0x2c4   :  { %255 = vst.msk [vmem:[#allocation6 + $0x1] sm:$0x1] %vm253_vm6, %v249_v41  ;;  %v289_v42 = vpop.f32.mrb[1].mxu1 }
 0x2c5   :  { %336 = shalt.err (!%p333_p12)
}
 0x2c6   :  { %s337_s10 = scalar_lea.hbm %s422_s4, 32 }
 0x2c7   :  { %p338_p13 = scmp.ne.s32.totalorder %s422_s4, %s337_s10  ;;  %p341_p0 = scmp.lt.u32.totalorder %s337_s10, %s422_s4 }
 0x2c9   :  { %p343_p1 = pnand %p341_p0, %p338_p13 }
 0x2cb   :  { %346 = shalt.err (!%p343_p1)
}
 0x2cc   :  { %s358_s15 = smov 16   ;;  %s359_s16 = smov 1  }
 0x2cd   :  { %267 = dma.vmem_to_hbm [thread:$0]  %s262_s3, 32, %s422_s4, [#allocation5], %s358_s15, %s358_s15, %s359_s16  }
 0x2ce   :  { %349 = dma.done.wait [#allocation5], 32  }
 0x2cf   :  { %350 = vsyncadd [#allocation5], 4294967264 }
 0x2d0   :  { %271 = vsyncpa [#allocation4], 1 }
 0x2d1   :  { %272 = vsyncpa [#allocation5], 1 }

</bundles_post_ra>
